<compile_context>
chip_gen: v6e
topology: v6e:2x2x1
jax: 0.10.0
libtpu: 0.0.40
codegen_flags: <defaults>
</compile_context>

<pallas_src>
import functools

import jax
import jax.numpy as jnp
from jax import lax
from jax.experimental import pallas as pl
from jax.experimental.pallas import tpu as pltpu

# contract dim 1 of lhs (M,K) with dim 1 of rhs (N,K)  ->  (M, N)
_CONTRACT_DIM1 = (((1,), (1,)), ((), ()))


def _single_block_kernel(x_ref, w_ref, b_ref, o_ref, *, use_bf16):
    # x: (M, K), w: (N, K), b: (1, N), o: (M, N).  One MXU pass, no grid.
    x = x_ref[...]
    w = w_ref[...]
    if use_bf16:
        x = x.astype(jnp.bfloat16)
        w = w.astype(jnp.bfloat16)
    acc = lax.dot_general(x, w, _CONTRACT_DIM1, preferred_element_type=jnp.float32)
    o_ref[...] = (acc + b_ref[...].astype(jnp.float32)).astype(o_ref.dtype)


def _tiled_kernel(x_ref, w_ref, b_ref, o_ref, acc_ref, *, use_bf16):
    # x: (tm, tk), w: (tn, tk), b: (1, tn), o: (tm, tn), acc: (tm, tn) f32.
    k = pl.program_id(2)

    @pl.when(k == 0)
    def _():
        acc_ref[...] = jnp.zeros_like(acc_ref)

    x = x_ref[...]
    w = w_ref[...]
    if use_bf16:
        x = x.astype(jnp.bfloat16)
        w = w.astype(jnp.bfloat16)

    acc_ref[...] += lax.dot_general(
        x, w, _CONTRACT_DIM1, preferred_element_type=jnp.float32)

    @pl.when(k == pl.num_programs(2) - 1)
    def _():
        o_ref[...] = (acc_ref[...] + b_ref[...].astype(jnp.float32)).astype(o_ref.dtype)


def _round_up(a, b):
    return (a + b - 1) // b * b


def _pick_tile(dim, candidates):
    """Largest candidate dividing `dim` exactly; else largest candidate (pad)."""
    for t in candidates:
        if dim % t == 0:
            return t
    return candidates[0]


def linear_eval_forward(x, weight, bias, *, use_bf16=False):
    """y = x @ weight.T + bias (PyTorch nn.Linear semantics) on TPU via Pallas.

    x:      (M, K)
    weight: (N, K)  PyTorch layout, used as-is (no transpose copy)
    bias:   (N,)
    """
    M, K = x.shape
    N, K2 = weight.shape
    assert K == K2, "input_dim mismatch"
    b2d = bias.reshape(1, N)

    # ---- small-problem fast path: single MXU pass, whole arrays in VMEM ----
    if M <= 256 and N <= 512 and K <= 512:
        kern = functools.partial(_single_block_kernel, use_bf16=use_bf16)
        return pl.pallas_call(
            kern,
            out_shape=jax.ShapeDtypeStruct((M, N), x.dtype),
        )(x, weight, b2d)

    # ---- tiled path: MXU-aligned tiles, K streamed on an 'arbitrary' axis ----
    # Max tiles (256, 512, 512) keep double-buffered VMEM use ~5 MiB, well under
    # the scoped VMEM limit on v5e / v6e / v7x (64 MiB physical on v7x).
    tm = _pick_tile(M, (256, 128)) if M >= 128 else _round_up(M, 8)
    tn = _pick_tile(N, (512, 256, 128)) if N >= 128 else 128
    tk = _pick_tile(K, (512, 256, 128)) if K >= 128 else 128

    m_pad, n_pad, k_pad = _round_up(M, tm), _round_up(N, tn), _round_up(K, tk)

    # Pad only when a dimension is not already a tile multiple.
    # TODO(synk): in a real eval deployment, pre-pad / pre-format the static
    # weight once outside the hot path instead of per call.
    x_p = x if (m_pad == M and k_pad == K) else jnp.pad(
        x, ((0, m_pad - M), (0, k_pad - K)))
    w_p = weight if (n_pad == N and k_pad == K) else jnp.pad(
        weight, ((0, n_pad - N), (0, k_pad - K)))
    b_p = b2d if n_pad == N else jnp.pad(b2d, ((0, 0), (0, n_pad - N)))

    grid = (m_pad // tm, n_pad // tn, k_pad // tk)
    kern = functools.partial(_tiled_kernel, use_bf16=use_bf16)

    out = pl.pallas_call(
        kern,
        out_shape=jax.ShapeDtypeStruct((m_pad, n_pad), x.dtype),
        grid_spec=pltpu.PrefetchScalarGridSpec(
            num_scalar_prefetch=0,
            grid=grid,
            in_specs=[
                pl.BlockSpec((tm, tk), lambda i, j, k: (i, k)),   # x  (M, K)
                pl.BlockSpec((tn, tk), lambda i, j, k: (j, k)),   # W  (N, K)
                pl.BlockSpec((1, tn), lambda i, j, k: (0, j)),    # b  (1, N)
            ],
            out_specs=pl.BlockSpec((tm, tn), lambda i, j, k: (i, j)),
            scratch_shapes=[pltpu.VMEM((tm, tn), jnp.float32)],
        ),
        compiler_params=pltpu.CompilerParams(
            dimension_semantics=("parallel", "parallel", "arbitrary"),
        ),
    )(x_p, w_p, b_p)

    if m_pad != M or n_pad != N:
        out = out[:M, :N]
    return out


def _ref(x, w, b):
    # High-precision reference (avoids default bf16 matmul passes on TPU).
    return jnp.dot(x, w.T, precision=lax.Precision.HIGHEST) + b


if __name__ == "__main__":
    # Module config (opt): input_dim=32, output_dim=128; batch=8.
    input_dim, output_dim, batch = 32, 128, 8

    key = jax.random.PRNGKey(0)
    kx, kw, kb = jax.random.split(key, 3)
    x = jax.random.normal(kx, (batch, input_dim), dtype=jnp.float32)

    # LinearEval._init_weights zeroes both weight and bias deterministically.
    weight = jnp.zeros((output_dim, input_dim), dtype=jnp.float32)
    bias = jnp.zeros((output_dim,), dtype=jnp.float32)

    y = jax.block_until_ready(linear_eval_forward(x, weight, bias))
    assert y.shape == (batch, output_dim)
    assert jnp.allclose(y, _ref(x, weight, bias), atol=1e-5), "mismatch (zero params)"

    # Non-zero params through the same single-block fast path.
    w_r = jax.random.normal(kw, (output_dim, input_dim), dtype=jnp.float32) * 0.05
    b_r = jax.random.normal(kb, (output_dim,), dtype=jnp.float32) * 0.05
    y_r = jax.block_until_ready(linear_eval_forward(x, w_r, b_r))
    assert jnp.allclose(y_r, _ref(x, w_r, b_r), atol=2e-2, rtol=2e-2), "mismatch (small path)"

    # Exercise the tiled, K-streamed path at a modest size (no padding needed).
    M2, K2, N2 = 16, 640, 256
    x2 = jax.random.normal(kx, (M2, K2), dtype=jnp.float32)
    w2 = jax.random.normal(kw, (N2, K2), dtype=jnp.float32) * 0.02
    b2 = jax.random.normal(kb, (N2,), dtype=jnp.float32) * 0.02
    y2 = jax.block_until_ready(linear_eval_forward(x2, w2, b2))
    assert y2.shape == (M2, N2)
    assert jnp.allclose(y2, _ref(x2, w2, b2), atol=2e-2, rtol=2e-2), "mismatch (tiled path)"

    print("KERNEL_OK")
</pallas_src>

<mosaic_0001>
module attributes {stable_mosaic.version = 11 : i64} {
  func.func @_single_block_kernel(%arg0: memref<8x32xf32, #tpu.memory_space<vmem>>, %arg1: memref<128x32xf32, #tpu.memory_space<vmem>>, %arg2: memref<1x128xf32, #tpu.memory_space<vmem>>, %arg3: memref<8x128xf32, #tpu.memory_space<vmem>>) attributes {dimension_semantics = [], scalar_prefetch = 0 : i64, scratch_operands = 0 : i64, tpu.core_type = #tpu.core_type<tc>} {
    %c0 = arith.constant 0 : index
    %c0_0 = arith.constant 0 : index
    %0 = vector.load %arg0[%c0, %c0_0] : memref<8x32xf32, #tpu.memory_space<vmem>>, vector<8x32xf32>
    %c0_1 = arith.constant 0 : index
    %c0_2 = arith.constant 0 : index
    %1 = vector.load %arg1[%c0_1, %c0_2] : memref<128x32xf32, #tpu.memory_space<vmem>>, vector<128x32xf32>
    %cst = arith.constant dense<0.000000e+00> : vector<8x128xf32>
    %2 = tpu.matmul %0, %1, %cst {dimension_numbers = #tpu.dot_dimension_numbers<[1], [1], [0], [0], [0, 0, 1, 0], [], []>} : vector<8x32xf32>, vector<128x32xf32>, vector<8x128xf32> -> vector<8x128xf32>
    %c0_3 = arith.constant 0 : index
    %c0_4 = arith.constant 0 : index
    %3 = vector.load %arg2[%c0_3, %c0_4] : memref<1x128xf32, #tpu.memory_space<vmem>>, vector<1x128xf32>
    %4 = vector.broadcast %3 : vector<1x128xf32> to vector<8x128xf32>
    %5 = arith.addf %2, %4 : vector<8x128xf32>
    %c0_5 = arith.constant 0 : index
    %c0_6 = arith.constant 0 : index
    %6 = vector.load %arg3[%c0_5, %c0_6] : memref<8x128xf32, #tpu.memory_space<vmem>>, vector<8x128xf32>
    tpu.vector_store %arg3[%c0_5, %c0_6], %5 {strides = array<i32>} : memref<8x128xf32, #tpu.memory_space<vmem>>, vector<8x128xf32>,
    return
  }
}

</mosaic_0001>

<bundles_post_ra>
// kernel: tpu_custom_call.1
= control target key start
LH: loop header
LB: loop body
LE: loop exit
PB: predicated region body
PF: predicated region fallthrough
CT: control target
= control target key end

     0   :  { %vm39_vm0 = vcmask 261120   ;;  %v271_v1 = vmov 0.0   ;;  %vm272_vm1 = vmmov 0   ;;  %s368_s0 = inlined_call_operand.vmem [shape: f32[8,32], index: 0, kind: input, shape index: {}]   ;;  %s369_s1 = inlined_call_operand.vmem [shape: f32[128,32], index: 1, kind: input, shape index: {}]   ;;  %s370_s2 = inlined_call_operand.vmem [shape: f32[1,128], index: 2, kind: input, shape index: {}]   ;;  %s371_s3 = inlined_call_operand.hbm [shape: f32[8,128], index: 3, kind: output, shape index: {}]  }
   0x1   :  { %v31_v0 = vld [vmem:[%s369_s1 + $0x78] sm:$0xff]  ;;  %211 = vmatprep.subr.mxu0 %v271_v1  ;;  %243 = vmatprep.mubr.msk.f32.mxu0 %vm272_vm1, %v271_v1  ;;  %v30_v2 = vld [vmem:[%s369_s1 + $0x70] sm:$0xff] }
   0x2   :  { %212 = vmatpush3.xpose.msk.msra.mxu0 %vm39_vm0, %v31_v0 }
   0x3   :  { %213 = vmatprep.subr.mxu0 %v271_v1 }
   0x6   :  { %214 = vmatpush3.xpose.msk.msra.mxu0 %vm39_vm0, %v30_v2 }
   0x7   :  { %8 = vsyncpa [#allocation3], 0  ;;  %215 = vmatprep.subr.mxu0 %v271_v1  ;;  %v29_v3 = vld [vmem:[%s369_s1 + $0x68] sm:$0xff]  ;;  %v28_v4 = vld [vmem:[%s369_s1 + $0x60] sm:$0xff]  ;;  %s273_s21 = smov [#allocation2]  }
   0x8   :  { %v27_v5 = vld [vmem:[%s369_s1 + $0x58] sm:$0xff]  ;;  %v26_v6 = vld [vmem:[%s369_s1 + $0x50] sm:$0xff]  ;;  %v25_v7 = vld [vmem:[%s369_s1 + $0x48] sm:$0xff]  ;;  %s168_s22 = sshll.u32 %s273_s21, 4  ;;  %s169_s22 = int_to_ptr.vmem [resolvable:$true] %s168_s22 }
   0x9   :  { %v24_v8 = vld [vmem:[%s369_s1 + $0x40] sm:$0xff]  ;;  %v23_v9 = vld [vmem:[%s369_s1 + $0x38] sm:$0xff]  ;;  %v22_v10 = vld [vmem:[%s369_s1 + $0x30] sm:$0xff]  ;;  %p254_p1 = scmp.lt.s32.totalorder %s169_s22, %s169_s22 }
   0xa   :  { %216 = vmatpush3.xpose.msk.msra.mxu0 %vm39_vm0, %v29_v3  ;;  %v21_v11 = vld [vmem:[%s369_s1 + $0x28] sm:$0xff]  ;;  %v20_v12 = vld [vmem:[%s369_s1 + $0x20] sm:$0xff]  ;;  %v19_v13 = vld [vmem:[%s369_s1 + $0x18] sm:$0xff] }
   0xb   :  { %217 = vmatprep.subr.mxu0 %v271_v1  ;;  %v18_v14 = vld [vmem:[%s369_s1 + $0x10] sm:$0xff]  ;;  %v17_v15 = vld [vmem:[%s369_s1 + $0x8] sm:$0xff]  ;;  %v16_v16 = vld [vmem:[%s369_s1] sm:$0xff]  ;;  %s249_s1 = scalar_lea.vmem %s169_s22, 128 }
   0xc   :  { %v15_v17 = vld [vmem:[%s368_s0] sm:$0xff]  ;;  %p250_p0 = scmp.ne.s32.totalorder %s169_s22, %s249_s1  ;;  %p255_p2 = scmp.lt.s32.totalorder %s249_s1, %s249_s1 }
   0xd   :  { %v176_v18 = vld [vmem:[%s370_s2] ss:$0 sm:$0xff] }
   0xe   :  { %218 = vmatpush3.xpose.msk.msra.mxu0 %vm39_vm0, %v28_v4  ;;  %p256_p3 = por %p255_p2, %p254_p1 }
   0xf   :  { %219 = vmatprep.subr.mxu0 %v271_v1 }
  0x10   :  { %p257_p4 = pnand %p256_p3, %p250_p0 }
  0x12   :  { %220 = vmatpush3.xpose.msk.msra.mxu0 %vm39_vm0, %v27_v5 }
  0x13   :  { %221 = vmatprep.subr.mxu0 %v271_v1 }
  0x16   :  { %222 = vmatpush3.xpose.msk.msra.mxu0 %vm39_vm0, %v26_v6 }
  0x17   :  { %223 = vmatprep.subr.mxu0 %v271_v1 }
  0x1a   :  { %224 = vmatpush3.xpose.msk.msra.mxu0 %vm39_vm0, %v25_v7 }
  0x1b   :  { %225 = vmatprep.subr.mxu0 %v271_v1 }
  0x1e   :  { %226 = vmatpush3.xpose.msk.msra.mxu0 %vm39_vm0, %v24_v8 }
  0x1f   :  { %227 = vmatprep.subr.mxu0 %v271_v1 }
  0x22   :  { %228 = vmatpush3.xpose.msk.msra.mxu0 %vm39_vm0, %v23_v9 }
  0x23   :  { %229 = vmatprep.subr.mxu0 %v271_v1 }
  0x26   :  { %230 = vmatpush3.xpose.msk.msra.mxu0 %vm39_vm0, %v22_v10 }
  0x27   :  { %231 = vmatprep.subr.mxu0 %v271_v1 }
  0x2a   :  { %232 = vmatpush3.xpose.msk.msra.mxu0 %vm39_vm0, %v21_v11 }
  0x2b   :  { %233 = vmatprep.subr.mxu0 %v271_v1 }
  0x2e   :  { %234 = vmatpush3.xpose.msk.msra.mxu0 %vm39_vm0, %v20_v12 }
  0x2f   :  { %235 = vmatprep.subr.mxu0 %v271_v1 }
  0x32   :  { %236 = vmatpush3.xpose.msk.msra.mxu0 %vm39_vm0, %v19_v13 }
  0x33   :  { %237 = vmatprep.subr.mxu0 %v271_v1 }
  0x36   :  { %238 = vmatpush3.xpose.msk.msra.mxu0 %vm39_vm0, %v18_v14 }
  0x37   :  { %239 = vmatprep.subr.mxu0 %v271_v1 }
  0x3a   :  { %240 = vmatpush3.xpose.msk.msra.mxu0 %vm39_vm0, %v17_v15 }
  0x3b   :  { %241 = vmatprep.subr.mxu0 %v271_v1 }
  0x3e   :  { %242 = vmatpush3.xpose.msk.msra.mxu0 %vm39_vm0, %v16_v16 }
  0x41   :  { %244 = vmatmul.mubr.msk.f32.vlgmr.msra.gmra.mxu0 %vm39_vm0, %v15_v17 }
 0x101   :  { %v157_v19 = vpop.f32.mrf.mxu0 }
 0x102   :  { %v158_v20 = vadd.f32 %v176_v18, %v157_v19 }
 0x103   :  { %v245_v21 = vpop.f32.mrf.mxu0 }
 0x104   :  { %161 = vst [vmem:[#allocation2] sm:$0xff] %v158_v20 }
 0x105   :  { %260 = shalt.err (!%p257_p4)
}
 0x106   :  { %171 = dma.vmem_to_hbm [thread:$0]  %s169_s22, 128, %s371_s3, [#allocation3]  }
 0x107   :  { %269 = dma.done.wait [#allocation3], 128  }
 0x108   :  { %270 = vsyncadd [#allocation3], 4294967168 }
 0x109   :  { %175 = vsyncpa [#allocation3], 1 }

</bundles_post_ra>
